<compile_context>
chip_gen: v7x
topology: tpu7x:2x2x1
jax: 0.10.0
libtpu: 0.0.40
codegen_flags: <defaults>
</compile_context>

<pallas_src>
import functools

import numpy as np
import jax
import jax.numpy as jnp
from jax import lax
from jax.experimental import pallas as pl
from jax.experimental.pallas import tpu as pltpu

_BN_EPS = 1e-3
_CIN = 1792
_CMID = 192


# ------------------------------ Pallas kernel ------------------------------ #

def _block8_kernel(x_ref, m_ref,
                   w0_ref, b0_ref,
                   w10_ref, b10_ref,
                   w11_ref, b11_ref,
                   w12_ref, b12_ref,
                   c2a_ref, c2b_ref, c2bias_ref,
                   o_ref, *, scale, apply_relu, sh_wl, sh_wr, sh_hu, sh_hd):
    # x_ref : (R, 1792) f32 rows (R = images_per_block * H * W, tail-padded to 16)
    # m_ref : (4, R, 1) f32 destination-row masks for the [w-1, w+1, h-1, h+1] taps
    # w0/w10: (1792, 192) bf16     b*: (1, 192) f32
    # w11/w12: (3, 192, 192) bf16 per-tap weights
    # c2a/c2b: (192, 1792) bf16    c2bias: (1, 1792) f32
    x_f32 = x_ref[...]                       # residual, kept in f32
    x = x_f32.astype(jnp.bfloat16)

    def mm(a, wt):                           # bf16 x bf16 -> f32 accumulate (MXU)
        return jnp.dot(a, wt, preferred_element_type=jnp.float32)

    def row_shift(y, s):                     # static sublane rotation (XLU)
        return y if s == 0 else pltpu.roll(y, s, 0)

    # branch0 / branch1[0]: 1x1 convs 1792 -> 192 (+folded BN, ReLU)
    x0 = jnp.maximum(mm(x, w0_ref[...]) + b0_ref[...], 0.0).astype(jnp.bfloat16)
    x1 = jnp.maximum(mm(x, w10_ref[...]) + b10_ref[...], 0.0).astype(jnp.bfloat16)

    # branch1[1]: (1,3) conv, pad (0,1).  Per-tap matmuls on the un-shifted rows,
    # then the +/-1 (along W) shifts applied to the results via roll + mask.
    acc = mm(x1, w11_ref[1])
    acc = acc + row_shift(mm(x1, w11_ref[0]), sh_wl) * m_ref[0]
    acc = acc + row_shift(mm(x1, w11_ref[2]), sh_wr) * m_ref[1]
    x1 = jnp.maximum(acc + b11_ref[...], 0.0).astype(jnp.bfloat16)

    # branch1[2]: (3,1) conv, pad (1,0): +/-W row shifts.
    acc = mm(x1, w12_ref[1])
    acc = acc + row_shift(mm(x1, w12_ref[0]), sh_hu) * m_ref[2]
    acc = acc + row_shift(mm(x1, w12_ref[2]), sh_hd) * m_ref[3]
    x1 = jnp.maximum(acc + b12_ref[...], 0.0).astype(jnp.bfloat16)

    # conv2d 1x1 (384 -> 1792, with bias); K split into the x0 / x1 halves so the
    # torch.cat((x0, x1), 1) never has to be materialized.
    out = mm(x0, c2a_ref[...]) + mm(x1, c2b_ref[...]) + c2bias_ref[...]
    if scale != 1.0:
        out = out * scale
    out = out + x_f32
    if apply_relu:
        out = jnp.maximum(out, 0.0)
    o_ref[...] = out


# ------------------------ pltpu.roll direction probe ------------------------ #

_ROLL_SIGN = None


def _roll_sign():
    """+1 if pltpu.roll matches jnp.roll (out[i] = in[i-shift]); -1 otherwise.

    Resolved once with a tiny probe kernel; must first be called outside jit
    (main() does this before jitting the forward pass).
    """
    global _ROLL_SIGN
    if _ROLL_SIGN is None:
        def probe_kernel(x_ref, o_ref):
            o_ref[...] = pltpu.roll(x_ref[...], 1, 0)
        x = jnp.zeros((8, 128), jnp.float32).at[1, 0].set(1.0)
        y = pl.pallas_call(
            probe_kernel,
            out_shape=jax.ShapeDtypeStruct((8, 128), jnp.float32))(x)
        _ROLL_SIGN = 1 if float(y[2, 0]) == 1.0 else -1
    return _ROLL_SIGN


# ------------------------- parameter initialization ------------------------ #

def _basic_conv_params(key, cin, cout, kh, kw, w_std=0.03):
    """Conv(bias=False) + BatchNorm(eval) folded into (weight, bias)."""
    kw_, kg, kb, km, kv = jax.random.split(key, 5)
    w = jax.random.normal(kw_, (cout, cin, kh, kw), jnp.float32) * w_std  # OIHW
    gamma = jax.random.uniform(kg, (cout,), jnp.float32, 0.5, 1.5)
    beta = jax.random.normal(kb, (cout,), jnp.float32) * 0.1
    rmean = jax.random.normal(km, (cout,), jnp.float32) * 0.1
    rvar = jax.random.uniform(kv, (cout,), jnp.float32, 0.5, 1.5)
    s = gamma / jnp.sqrt(rvar + _BN_EPS)
    bias = beta - rmean * s
    w_folded = w * s[:, None, None, None]
    return w_folded, bias.reshape(1, cout)


def init_block8_params(key):
    keys = jax.random.split(key, 6)
    p = {}
    # branch0: 1x1 conv 1792 -> 192
    w, b = _basic_conv_params(keys[0], _CIN, _CMID, 1, 1)
    p["b0_w"] = w[:, :, 0, 0].T.astype(jnp.bfloat16)                 # (1792, 192)
    p["b0_b"] = b
    # branch1[0]: 1x1 conv 1792 -> 192
    w, b = _basic_conv_params(keys[1], _CIN, _CMID, 1, 1)
    p["b1_0_w"] = w[:, :, 0, 0].T.astype(jnp.bfloat16)               # (1792, 192)
    p["b1_0_b"] = b
    # branch1[1]: (1,3) conv 192 -> 192, pad (0,1); per-tap (3, cin, cout)
    w, b = _basic_conv_params(keys[2], _CMID, _CMID, 1, 3)
    p["b1_1_w"] = jnp.transpose(w[:, :, 0, :], (2, 1, 0)).astype(jnp.bfloat16)
    p["b1_1_b"] = b
    # branch1[2]: (3,1) conv 192 -> 192, pad (1,0); per-tap (3, cin, cout)
    w, b = _basic_conv_params(keys[3], _CMID, _CMID, 3, 1)
    p["b1_2_w"] = jnp.transpose(w[:, :, :, 0], (2, 1, 0)).astype(jnp.bfloat16)
    p["b1_2_b"] = b
    # final conv2d: 1x1 conv 384 -> 1792, with bias; split into the x0 / x1 halves
    wc = jax.random.normal(keys[4], (_CIN, 2 * _CMID, 1, 1), jnp.float32) * 0.03
    bc = jax.random.normal(keys[5], (_CIN,), jnp.float32) * 0.1
    wcm = wc[:, :, 0, 0].T                                           # (384, 1792)
    p["c2_w_a"] = wcm[:_CMID].astype(jnp.bfloat16)                   # x0 half
    p["c2_w_b"] = wcm[_CMID:].astype(jnp.bfloat16)                   # x1 half
    p["c2_b"] = bc.reshape(1, _CIN)
    return p


# ------------------------------ wrapper / glue ------------------------------ #

def _pick_images_per_block(n, t, target_rows):
    """Largest divisor of n whose packed + tail-padded row count fits target_rows."""
    best = 1
    for d in range(1, n + 1):
        if n % d == 0 and ((d * t + 15) // 16) * 16 <= target_rows:
            best = d
    return best


def _build_row_masks(h, w, nb, r):
    """(4, r, 1) f32 destination-row masks for the [w-1, w+1, h-1, h+1] shifted taps.

    A mask is 1 only where the shifted source row is a valid spatial neighbour
    inside the SAME image; this also kills roll wrap-around, image-boundary and
    tail-padding contamination.
    """
    t = h * w
    local = np.arange(r)
    s = local % t
    hh, ww = s // w, s % w
    valid = local < nb * t
    m = np.stack([(ww > 0) & valid,          # fetch (h, w-1)
                  (ww < w - 1) & valid,      # fetch (h, w+1)
                  (hh > 0) & valid,          # fetch (h-1, w)
                  (hh < h - 1) & valid],     # fetch (h+1, w)
                 ).astype(np.float32)
    return jnp.asarray(m[:, :, None])        # (4, r, 1)


def _pinned(a):
    zeros = (0,) * a.ndim
    return pl.BlockSpec(a.shape, lambda i, _z=zeros: _z)


def _nbytes(a):
    return int(a.size) * a.dtype.itemsize


def block8_forward_nhwc(params, x_nhwc, scale=1.0, noReLU=False, target_rows=512):
    """Fused Block8 on an NHWC tensor (N, H, W, 1792) -> same shape, f32."""
    n, h, w, c = x_nhwc.shape
    t = h * w

    # Pack `nb` whole images contiguously per block (no per-image padding); pad
    # only the block tail up to a multiple of 16 (bf16 sublane packing).
    # TODO(synk): on v7x keep n_blocks >= 2 so the 1-D "parallel" grid shards
    # across both TensorCores; on single-TC chips a grid of 1 maximizes the tile.
    nb = _pick_images_per_block(n, t, target_rows)
    n_blocks = n // nb
    r = ((nb * t + 15) // 16) * 16                 # rows per grid step

    x = x_nhwc.astype(jnp.float32).reshape(n_blocks, nb * t, c)
    if r != nb * t:
        x = jnp.pad(x, ((0, 0), (0, r - nb * t), (0, 0)))
    xf = x.reshape(n_blocks * r, c)

    masks = _build_row_masks(h, w, nb, r)          # identical for every block

    # Static, positive row-shift amounts (mod r) for the four shifted taps,
    # adjusted for the hardware roll direction.
    sgn = _roll_sign()
    sh_wl = (sgn * 1) % r
    sh_wr = (-sgn * 1) % r
    sh_hu = (sgn * w) % r
    sh_hd = (-sgn * w) % r

    operands = (xf, masks,
                params["b0_w"], params["b0_b"],
                params["b1_0_w"], params["b1_0_b"],
                params["b1_1_w"], params["b1_1_b"],
                params["b1_2_w"], params["b1_2_b"],
                params["c2_w_a"], params["c2_w_b"], params["c2_b"])

    grid_spec = pltpu.PrefetchScalarGridSpec(
        num_scalar_prefetch=0,
        grid=(n_blocks,),
        in_specs=[pl.BlockSpec((r, c), lambda i: (i, 0))]      # activation rows
                 + [_pinned(a) for a in operands[1:]],          # masks + weights pinned
        out_specs=pl.BlockSpec((r, c), lambda i: (i, 0)),
    )

    p_rows = n_blocks * r
    flops = 2 * p_rows * (_CIN * _CMID * 2 + _CMID * _CMID * 6 + _CMID * _CIN * 2)
    bytes_accessed = 2 * _nbytes(xf) + sum(_nbytes(a) for a in operands[1:])

    kern = functools.partial(_block8_kernel, scale=float(scale),
                             apply_relu=not noReLU,
                             sh_wl=sh_wl, sh_wr=sh_wr, sh_hu=sh_hu, sh_hd=sh_hd)
    out = pl.pallas_call(
        kern,
        out_shape=jax.ShapeDtypeStruct((p_rows, c), jnp.float32),
        grid_spec=grid_spec,
        compiler_params=pltpu.CompilerParams(
            dimension_semantics=("parallel",),
            vmem_limit_bytes=48 * 1024 * 1024),
        cost_estimate=pl.CostEstimate(flops=flops, transcendentals=0,
                                      bytes_accessed=bytes_accessed),
    )(*operands)

    out = out.reshape(n_blocks, r, c)[:, :nb * t, :]
    return out.reshape(n, h, w, c)


def block8_forward(params, x_nchw, scale=1.0, noReLU=False):
    """NCHW interface matching the PyTorch module."""
    x = jnp.transpose(x_nchw, (0, 2, 3, 1))                      # NHWC
    out = block8_forward_nhwc(params, x, scale=scale, noReLU=noReLU)
    return jnp.transpose(out, (0, 3, 1, 2))                      # back to NCHW


# --------------------------- pure-JAX reference ----------------------------- #

def block8_reference(params, x_nchw, scale=1.0, noReLU=False):
    n, c, h, w = x_nchw.shape
    x = jnp.transpose(x_nchw, (0, 2, 3, 1))
    xf = x.reshape(n * h * w, c).astype(jnp.float32)

    def mbr(a, wgt, b):
        return jnp.maximum(
            jnp.dot(a.astype(jnp.bfloat16), wgt, preferred_element_type=jnp.float32) + b,
            0.0)

    def conv_taps(y, w_taps, b, axis):                 # axis: 2 = W, 1 = H (NHWC)
        yi = y.reshape(n, h, w, _CMID)
        pads = [(0, 0)] * 4
        pads[axis] = (1, 1)
        yp = jnp.pad(yi, pads)
        length = yi.shape[axis]
        acc = jnp.zeros((n * h * w, _CMID), jnp.float32)
        for k in range(3):
            sl = lax.slice_in_dim(yp, k, k + length, axis=axis)
            acc = acc + jnp.dot(sl.reshape(n * h * w, _CMID).astype(jnp.bfloat16),
                                w_taps[k], preferred_element_type=jnp.float32)
        return jnp.maximum(acc + b, 0.0)

    x0 = mbr(xf, params["b0_w"], params["b0_b"])
    x1 = mbr(xf, params["b1_0_w"], params["b1_0_b"])
    x1 = conv_taps(x1, params["b1_1_w"], params["b1_1_b"], axis=2)
    x1 = conv_taps(x1, params["b1_2_w"], params["b1_2_b"], axis=1)

    out = (jnp.dot(x0.astype(jnp.bfloat16), params["c2_w_a"],
                   preferred_element_type=jnp.float32)
           + jnp.dot(x1.astype(jnp.bfloat16), params["c2_w_b"],
                     preferred_element_type=jnp.float32)
           + params["c2_b"])
    out = out * scale + xf
    if not noReLU:
        out = jnp.maximum(out, 0.0)
    return jnp.transpose(out.reshape(n, h, w, c), (0, 3, 1, 2))


# ----------------------------------- main ----------------------------------- #

if __name__ == "__main__":
    key = jax.random.PRNGKey(0)
    pkey, xkey = jax.random.split(key)
    params = init_block8_params(pkey)

    # Block8's channel count is fixed by the module (1792 in/out); keep spatial small.
    x = jax.random.normal(xkey, (2, 1792, 3, 3), jnp.float32)

    _roll_sign()   # resolve the pltpu.roll direction with the tiny probe (outside jit)

    fwd = jax.jit(functools.partial(block8_forward, scale=1.0, noReLU=False))
    out = jax.block_until_ready(fwd(params, x))

    ref = block8_reference(params, x, scale=1.0, noReLU=False)
    assert out.shape == x.shape, (out.shape, x.shape)
    max_err = float(jnp.max(jnp.abs(out - ref)))
    assert jnp.allclose(out, ref, atol=1e-2, rtol=1e-2), f"mismatch vs reference: {max_err}"

    print("KERNEL_OK")
</pallas_src>

<mosaic_0001>
module attributes {stable_mosaic.version = 11 : i64} {
  func.func @probe_kernel(%arg0: memref<8x128xf32, #tpu.memory_space<vmem>>, %arg1: memref<8x128xf32, #tpu.memory_space<vmem>>) attributes {dimension_semantics = [], scalar_prefetch = 0 : i64, scratch_operands = 0 : i64, tpu.core_type = #tpu.core_type<tc>} {
    %c0 = arith.constant 0 : index
    %c0_0 = arith.constant 0 : index
    %0 = vector.load %arg0[%c0, %c0_0] : memref<8x128xf32, #tpu.memory_space<vmem>>, vector<8x128xf32>
    %c1_i32 = arith.constant 1 : i32
    %1 = tpu.dynamic_rotate %0 by %c1_i32 dim 0 : vector<8x128xf32>, i32 -> vector<8x128xf32>
    %c0_1 = arith.constant 0 : index
    %c0_2 = arith.constant 0 : index
    %2 = vector.load %arg1[%c0_1, %c0_2] : memref<8x128xf32, #tpu.memory_space<vmem>>, vector<8x128xf32>
    tpu.vector_store %arg1[%c0_1, %c0_2], %1 {strides = array<i32>} : memref<8x128xf32, #tpu.memory_space<vmem>>, vector<8x128xf32>,
    return
  }
}

</mosaic_0001>

<bundles_post_ra>
// kernel: tpu_custom_call.1
= control target key start
LH: loop header
LB: loop body
LE: loop exit
PB: predicated region body
PF: predicated region fallthrough
CT: control target
= control target key end

     0   :  { %6 = vsyncpa [#allocation3], 0  ;;  %s125_s0 = inlined_call_operand.hbm [shape: f32[8,128], index: 0, kind: input, shape index: {}]   ;;  %s126_s1 = inlined_call_operand.hbm [shape: f32[8,128], index: 1, kind: output, shape index: {}]  }
   0x1   :  { %7 = vsyncpa [#allocation4], 0  ;;  %s89_s6 = smov [#allocation2]   ;;  %s41_s10 = scalar_lea.hbm %s125_s0, 128 }
   0x2   :  { %s14_s7 = sshll.u32 %s89_s6, 4  ;;  %p42_p0 = scmp.ne.s32.totalorder %s125_s0, %s41_s10  ;;  %s15_s7 = int_to_ptr.vmem [resolvable:$true] %s14_s7 }
   0x3   :  { %p45_p1 = scmp.lt.u32.totalorder %s41_s10, %s125_s0 }
   0x5   :  { %p47_p2 = pnand %p45_p1, %p42_p0 }
   0x7   :  { %50 = shalt.err (!%p47_p2)
}
   0x8   :  { %s51_s15 = scalar_lea.vmem %s15_s7, 128  ;;  %p56_p4 = scmp.lt.s32.totalorder %s15_s7, %s15_s7 }
   0x9   :  { %p52_p3 = scmp.ne.s32.totalorder %s15_s7, %s51_s15  ;;  %p57_p5 = scmp.lt.s32.totalorder %s51_s15, %s51_s15 }
   0xb   :  { %p58_p6 = por %p57_p5, %p56_p4 }
   0xd   :  { %p59_p7 = pnand %p58_p6, %p52_p3 }
   0xf   :  { %62 = shalt.err (!%p59_p7)
}
  0x10   :  { %17 = dma.hbm_to_vmem [thread:$0]  %s125_s0, 128, %s15_s7, [#allocation3]  }
  0x11   :  { %85 = dma.done.wait [#allocation3], 128  }
  0x12   :  { %86 = vsyncadd [#allocation3], 4294967168  ;;  %s90_s18 = smov [#allocation5]   ;;  %v21_v0 = vld [vmem:[#allocation2] sm:$0xff] }
  0x13   :  { %s30_s19 = sshll.u32 %s90_s18, 4  ;;  %v22_v1 = vrot.slane %v21_v0, 7  ;;  %s31_s19 = int_to_ptr.vmem [resolvable:$true] %s30_s19 }
  0x14   :  { %s63_s20 = scalar_lea.vmem %s31_s19, 128  ;;  %p68_p9 = scmp.lt.s32.totalorder %s31_s19, %s31_s19 }
  0x15   :  { %23 = vst [vmem:[#allocation5] sm:$0xff] %v22_v1  ;;  %p64_p8 = scmp.ne.s32.totalorder %s31_s19, %s63_s20  ;;  %p69_p10 = scmp.lt.s32.totalorder %s63_s20, %s63_s20 }
  0x17   :  { %p70_p11 = por %p69_p10, %p68_p9 }
  0x19   :  { %p71_p12 = pnand %p70_p11, %p64_p8 }
  0x1b   :  { %74 = shalt.err (!%p71_p12)
}
  0x1c   :  { %s75_s23 = scalar_lea.hbm %s126_s1, 128 }
  0x1d   :  { %p76_p13 = scmp.ne.s32.totalorder %s126_s1, %s75_s23  ;;  %p79_p0 = scmp.lt.u32.totalorder %s75_s23, %s126_s1 }
  0x1f   :  { %p81_p1 = pnand %p79_p0, %p76_p13 }
  0x21   :  { %84 = shalt.err (!%p81_p1)
}
  0x22   :  { %33 = dma.vmem_to_hbm [thread:$0]  %s31_s19, 128, %s126_s1, [#allocation4]  }
  0x23   :  { %87 = dma.done.wait [#allocation4], 128  }
  0x24   :  { %88 = vsyncadd [#allocation4], 4294967168 }
  0x25   :  { %37 = vsyncpa [#allocation3], 1 }
  0x26   :  { %38 = vsyncpa [#allocation4], 1 }

</bundles_post_ra>
